<compile_context>
chip_gen: v7x
topology: tpu7x:2x2x1
jax: 0.10.0
libtpu: 0.0.40
codegen_flags: <defaults>
</compile_context>

<pallas_src>
import jax
import jax.numpy as jnp
from jax import lax
from jax.experimental import pallas as pl
from jax.experimental.pallas import tpu as pltpu

KERNEL = 4
STRIDE = 2
PADDING = 1
EPS = 1e-5
N_PHASE = STRIDE * STRIDE   # 4 sub-pixel phases for stride 2


# ------------------------------ Pallas kernel --------------------------------

def _fused_deconv_bn_kernel(w_ref, p_ref, g_ref, b_ref, o_ref):
    """Fused 4-phase ConvTranspose2d(4, 2, 1) + training-mode BatchNorm2d.

    w_ref : [4*C_out, 9*C_in]  bf16 phase-combined, transposed tap-weight matrix
    p_ref : [9*C_in, M]        bf16 lane-dense patch matrix (M = N*H*W on lanes)
    g_ref : [C_out, 1]         f32 BN gamma (column)
    b_ref : [C_out, 1]         f32 BN beta  (column)
    o_ref : [4*C_out, M]       f32, rows = phase*C_out + c, lanes = (n, y, x)
    """
    C_out = g_ref.shape[0]
    M = p_ref.shape[1]

    # Single MXU pass, result already in the lane-dense output layout.
    y = jnp.dot(w_ref[...], p_ref[...],
                preferred_element_type=jnp.float32)            # [4*C_out, M] f32

    # BatchNorm2d (training mode): per-channel batch stats pooled over the 4
    # phases.  One lane-reduction over M, then a tiny per-channel phase fold.
    s = jnp.sum(y, axis=1, keepdims=True)                      # [4*C_out, 1]
    ss = jnp.sum(y * y, axis=1, keepdims=True)                 # [4*C_out, 1]
    s_c = (s[0:C_out] + s[C_out:2 * C_out]
           + s[2 * C_out:3 * C_out] + s[3 * C_out:4 * C_out])  # [C_out, 1]
    ss_c = (ss[0:C_out] + ss[C_out:2 * C_out]
            + ss[2 * C_out:3 * C_out] + ss[3 * C_out:4 * C_out])

    inv_cnt = 1.0 / float(N_PHASE * M)
    mean = s_c * inv_cnt
    var = ss_c * inv_cnt - mean * mean                         # biased variance
    scale_c = lax.rsqrt(var + EPS) * g_ref[...]                # [C_out, 1] (EUP)
    shift_c = b_ref[...] - mean * scale_c

    # Tile per-channel scale/shift to the 4 phase row-groups (tiny sublane concat),
    # then a single broadcast multiply-add over M lanes.
    scale = jnp.concatenate([scale_c] * N_PHASE, axis=0)       # [4*C_out, 1]
    shift = jnp.concatenate([shift_c] * N_PHASE, axis=0)
    o_ref[...] = y * scale + shift


# --------------------------------- wrapper -----------------------------------

def upsample_conv_forward(x, weight, bias, gamma, beta):
    """UpSampleConv.forward (default config): BatchNorm2d(ConvTranspose2d(x)).

    x      : [N, C_in, H, W] f32 (NCHW, as in PyTorch)
    weight : [C_in, C_out, 4, 4] f32 (PyTorch ConvTranspose2d layout)
    bias   : [C_out] f32 -- accepted for API fidelity but unused: a per-channel
             constant cancels exactly under training-mode BatchNorm's mean
             subtraction (NOT valid for eval-mode BN with running stats).
    gamma, beta : [C_out] f32 BatchNorm2d affine parameters.
    Returns [N, C_out, 2H, 2W] f32 (NCHW).
    """
    del bias  # dead work under training-mode BN (mean subtraction cancels it)
    N, C_in, H, W = x.shape
    C_out = weight.shape[1]
    H_out, W_out = STRIDE * H, STRIDE * W
    M = N * H * W

    # ---- tiny XLA glue: pad by 1, build lane-dense transposed patch matrix ----
    # P[(dy*3+dx)*C_in + ci, n*H*W + y*W + x] = x_pad[n, ci, y+dy, x+dx]
    x_pad = jnp.pad(x, ((0, 0), (0, 0), (1, 1), (1, 1)))        # [N, C_in, H+2, W+2]
    taps = [x_pad[:, :, dy:dy + H, dx:dx + W]
            for dy in range(3) for dx in range(3)]              # 9 x [N, C_in, H, W]
    p_mat = jnp.stack(taps, axis=0)                             # [9, N, C_in, H, W]
    p_mat = p_mat.transpose(0, 2, 1, 3, 4).reshape(9 * C_in, M)
    p_mat = p_mat.astype(jnp.bfloat16)                          # [9*C_in, M]

    # ---- phase-combined weight matrix, transposed: [4*C_out, 9*C_in] ----------
    # Phase p = 2*py + px produces output pixel (2y+py, 2x+px); its 2x2 taps are
    # x_pad[y+dy, x+dx] for dy in {py, py+1}, dx in {px, px+1}, with kernel index
    # ky = 3 + py - 2*dy, kx = 3 + px - 2*dx.  Taps a phase does not use stay 0.
    w_big = jnp.zeros((9 * C_in, N_PHASE * C_out), jnp.float32)
    for py in range(2):
        for px in range(2):
            p_idx = 2 * py + px
            for dy in (py, py + 1):
                for dx in (px, px + 1):
                    ky = 3 + py - 2 * dy
                    kx = 3 + px - 2 * dx
                    r0 = (dy * 3 + dx) * C_in
                    w_big = w_big.at[r0:r0 + C_in,
                                     p_idx * C_out:(p_idx + 1) * C_out].set(
                                         weight[:, :, ky, kx])
    w_t = w_big.T.astype(jnp.bfloat16)                          # [4*C_out, 9*C_in]

    # ---- single fused Pallas kernel ------------------------------------------
    out_pm = pl.pallas_call(
        _fused_deconv_bn_kernel,
        out_shape=jax.ShapeDtypeStruct((N_PHASE * C_out, M), jnp.float32),
        grid=(1,),
        in_specs=[
            pl.BlockSpec((N_PHASE * C_out, 9 * C_in), lambda i: (0, 0)),
            pl.BlockSpec((9 * C_in, M), lambda i: (0, 0)),
            pl.BlockSpec((C_out, 1), lambda i: (0, 0)),
            pl.BlockSpec((C_out, 1), lambda i: (0, 0)),
        ],
        out_specs=pl.BlockSpec((N_PHASE * C_out, M), lambda i: (0, 0)),
        compiler_params=pltpu.CompilerParams(
            dimension_semantics=("arbitrary",)),
    )(w_t, p_mat, gamma.reshape(C_out, 1), beta.reshape(C_out, 1))

    # ---- pixel shuffle back to NCHW (cheap XLA glue on the small output) ------
    # TODO(synk): downstream layers could consume the kernel's phase/channel-major
    # [4*C_out, M] layout directly and skip this transpose entirely.
    out = out_pm.reshape(2, 2, C_out, N, H, W)        # [py, px, co, n, y, x]
    out = out.transpose(3, 2, 4, 0, 5, 1)             # [n, co, y, py, x, px]
    return out.reshape(N, C_out, H_out, W_out)

    # TODO(synk): Dropout2d path (dropout=True) not implemented; the module's
    # default config uses dropout=False, so forward semantics are complete as-is.


# ----------------------------- pure-JAX reference -----------------------------

def _reference(x, weight, bias, gamma, beta):
    # PyTorch semantics: ConvTranspose2d(4,2,1) WITH bias, then training-mode
    # BatchNorm2d (batch stats, biased variance, eps=1e-5).  Conv inputs are cast
    # to bf16 to match the kernel's MXU precision; accumulation is f32.
    w_t = jnp.flip(weight, axis=(2, 3)).transpose(1, 0, 2, 3)   # [C_out, C_in, 4, 4]
    pad = KERNEL - 1 - PADDING
    y = lax.conv_general_dilated(
        x.astype(jnp.bfloat16), w_t.astype(jnp.bfloat16),
        window_strides=(1, 1), padding=[(pad, pad), (pad, pad)],
        lhs_dilation=(STRIDE, STRIDE), rhs_dilation=(1, 1),
        dimension_numbers=("NCHW", "OIHW", "NCHW"),
        preferred_element_type=jnp.float32)
    y = y + bias[None, :, None, None]
    mean = y.mean(axis=(0, 2, 3), keepdims=True)
    var = y.var(axis=(0, 2, 3), keepdims=True)
    return (y - mean) / jnp.sqrt(var + EPS) * gamma[None, :, None, None] \
        + beta[None, :, None, None]


# ------------------------------------ main ------------------------------------

if __name__ == "__main__":
    key = jax.random.PRNGKey(0)
    k_x, k_w, k_b, k_g, k_be = jax.random.split(key, 5)

    N, C_in, H, W = 2, 4, 16, 16
    C_out = 8

    x = jax.random.normal(k_x, (N, C_in, H, W), jnp.float32)
    # ConvTranspose2d weight layout: [in_channels, out_channels, KH, KW]
    weight = 0.1 * jax.random.normal(k_w, (C_in, C_out, KERNEL, KERNEL), jnp.float32)
    bias = 0.1 * jax.random.normal(k_b, (C_out,), jnp.float32)
    gamma = 1.0 + 0.1 * jax.random.normal(k_g, (C_out,), jnp.float32)
    beta = 0.1 * jax.random.normal(k_be, (C_out,), jnp.float32)

    out = upsample_conv_forward(x, weight, bias, gamma, beta)
    out = jax.block_until_ready(out)

    ref = _reference(x, weight, bias, gamma, beta)
    assert out.shape == (N, C_out, STRIDE * H, STRIDE * W), out.shape
    max_err = float(jnp.max(jnp.abs(out - ref)))
    assert jnp.allclose(out, ref, atol=5e-3, rtol=5e-3), max_err

    print("KERNEL_OK")
</pallas_src>

<mosaic_0001>
module attributes {stable_mosaic.version = 11 : i64} {
  func.func @_fused_deconv_bn_kernel(%arg0: i32, %arg1: memref<32x36xbf16, #tpu.memory_space<vmem>>, %arg2: memref<36x512xbf16, #tpu.memory_space<vmem>>, %arg3: memref<8x1xf32, #tpu.memory_space<vmem>>, %arg4: memref<8x1xf32, #tpu.memory_space<vmem>>, %arg5: memref<32x512xf32, #tpu.memory_space<vmem>>) attributes {dimension_semantics = [#tpu.dimension_semantics<arbitrary>], iteration_bounds = array<i64: 1>, scalar_prefetch = 0 : i64, scratch_operands = 0 : i64, tpu.core_type = #tpu.core_type<tc>, window_params = [{pipeline_mode = #tpu.pipeline_mode<synchronous>, transform_indices = @transform_0, window_bounds = array<i64: 32, 36>}, {pipeline_mode = #tpu.pipeline_mode<synchronous>, transform_indices = @transform_1, window_bounds = array<i64: 36, 512>}, {pipeline_mode = #tpu.pipeline_mode<synchronous>, transform_indices = @transform_2, window_bounds = array<i64: 8, 1>}, {pipeline_mode = #tpu.pipeline_mode<synchronous>, transform_indices = @transform_3, window_bounds = array<i64: 8, 1>}, {pipeline_mode = #tpu.pipeline_mode<synchronous>, transform_indices = @transform_4, window_bounds = array<i64: 32, 512>}]} {
    %c0 = arith.constant 0 : index
    %c0_0 = arith.constant 0 : index
    %0 = vector.load %arg1[%c0, %c0_0] : memref<32x36xbf16, #tpu.memory_space<vmem>>, vector<32x36xbf16>
    %c0_1 = arith.constant 0 : index
    %c0_2 = arith.constant 0 : index
    %1 = vector.load %arg2[%c0_1, %c0_2] : memref<36x512xbf16, #tpu.memory_space<vmem>>, vector<36x512xbf16>
    %cst = arith.constant dense<0.000000e+00> : vector<32x512xf32>
    %2 = tpu.matmul %0, %1, %cst {dimension_numbers = #tpu.dot_dimension_numbers<[1], [0], [0], [1], [0, 0, 1, 1], [], []>} : vector<32x36xbf16>, vector<36x512xbf16>, vector<32x512xf32> -> vector<32x512xf32>
    %cst_3 = arith.constant dense<0.000000e+00> : vector<32xf32>
    %3 = vector.multi_reduction <add>, %2, %cst_3 [1] : vector<32x512xf32> to vector<32xf32>
    %4 = vector.shape_cast %3 : vector<32xf32> to vector<32x1xf32>
    %5 = arith.mulf %2, %2 : vector<32x512xf32>
    %cst_4 = arith.constant dense<0.000000e+00> : vector<32xf32>
    %6 = vector.multi_reduction <add>, %5, %cst_4 [1] : vector<32x512xf32> to vector<32xf32>
    %7 = vector.shape_cast %6 : vector<32xf32> to vector<32x1xf32>
    %8 = vector.extract_strided_slice %4 {offsets = [0, 0], sizes = [8, 1], strides = [1, 1]} : vector<32x1xf32> to vector<8x1xf32>
    %9 = vector.extract_strided_slice %4 {offsets = [8, 0], sizes = [8, 1], strides = [1, 1]} : vector<32x1xf32> to vector<8x1xf32>
    %10 = arith.addf %8, %9 : vector<8x1xf32>
    %11 = vector.extract_strided_slice %4 {offsets = [16, 0], sizes = [8, 1], strides = [1, 1]} : vector<32x1xf32> to vector<8x1xf32>
    %12 = arith.addf %10, %11 : vector<8x1xf32>
    %13 = vector.extract_strided_slice %4 {offsets = [24, 0], sizes = [8, 1], strides = [1, 1]} : vector<32x1xf32> to vector<8x1xf32>
    %14 = arith.addf %12, %13 : vector<8x1xf32>
    %15 = vector.extract_strided_slice %7 {offsets = [0, 0], sizes = [8, 1], strides = [1, 1]} : vector<32x1xf32> to vector<8x1xf32>
    %16 = vector.extract_strided_slice %7 {offsets = [8, 0], sizes = [8, 1], strides = [1, 1]} : vector<32x1xf32> to vector<8x1xf32>
    %17 = arith.addf %15, %16 : vector<8x1xf32>
    %18 = vector.extract_strided_slice %7 {offsets = [16, 0], sizes = [8, 1], strides = [1, 1]} : vector<32x1xf32> to vector<8x1xf32>
    %19 = arith.addf %17, %18 : vector<8x1xf32>
    %20 = vector.extract_strided_slice %7 {offsets = [24, 0], sizes = [8, 1], strides = [1, 1]} : vector<32x1xf32> to vector<8x1xf32>
    %21 = arith.addf %19, %20 : vector<8x1xf32>
    %cst_5 = arith.constant 4.8828125E-4 : f32
    %22 = vector.broadcast %cst_5 : f32 to vector<8x1xf32>
    %23 = arith.mulf %14, %22 : vector<8x1xf32>
    %cst_6 = arith.constant 4.8828125E-4 : f32
    %24 = vector.broadcast %cst_6 : f32 to vector<8x1xf32>
    %25 = arith.mulf %21, %24 : vector<8x1xf32>
    %26 = arith.mulf %23, %23 : vector<8x1xf32>
    %27 = arith.subf %25, %26 : vector<8x1xf32>
    %cst_7 = arith.constant 9.99999974E-6 : f32
    %28 = vector.broadcast %cst_7 : f32 to vector<8x1xf32>
    %29 = arith.addf %27, %28 : vector<8x1xf32>
    %30 = math.rsqrt %29 : vector<8x1xf32>
    %c0_8 = arith.constant 0 : index
    %c0_9 = arith.constant 0 : index
    %31 = vector.load %arg3[%c0_8, %c0_9] : memref<8x1xf32, #tpu.memory_space<vmem>>, vector<8x1xf32>
    %32 = arith.mulf %30, %31 : vector<8x1xf32>
    %c0_10 = arith.constant 0 : index
    %c0_11 = arith.constant 0 : index
    %33 = vector.load %arg4[%c0_10, %c0_11] : memref<8x1xf32, #tpu.memory_space<vmem>>, vector<8x1xf32>
    %34 = arith.mulf %23, %32 : vector<8x1xf32>
    %35 = arith.subf %33, %34 : vector<8x1xf32>
    %36 = tpu.concatenate %32, %32, %32, %32 in 0 : vector<8x1xf32>, vector<8x1xf32>, vector<8x1xf32>, vector<8x1xf32> -> vector<32x1xf32>
    %37 = tpu.concatenate %35, %35, %35, %35 in 0 : vector<8x1xf32>, vector<8x1xf32>, vector<8x1xf32>, vector<8x1xf32> -> vector<32x1xf32>
    %38 = vector.broadcast %36 : vector<32x1xf32> to vector<32x512xf32>
    %39 = arith.mulf %2, %38 : vector<32x512xf32>
    %40 = vector.broadcast %37 : vector<32x1xf32> to vector<32x512xf32>
    %41 = arith.addf %39, %40 : vector<32x512xf32>
    %c0_12 = arith.constant 0 : index
    %c0_13 = arith.constant 0 : index
    %42 = vector.load %arg5[%c0_12, %c0_13] : memref<32x512xf32, #tpu.memory_space<vmem>>, vector<32x512xf32>
    tpu.vector_store %arg5[%c0_12, %c0_13], %41 {strides = array<i32>} : memref<32x512xf32, #tpu.memory_space<vmem>>, vector<32x512xf32>,
    return
  }
  func.func @transform_0(%arg0: i32) -> (i32, i32) {
    %c0_i32 = arith.constant 0 : i32
    %c0_i32_0 = arith.constant 0 : i32
    %c0_i32_1 = arith.constant 0 : i32
    return %c0_i32, %c0_i32_0 : i32, i32
  }
  func.func @transform_1(%arg0: i32) -> (i32, i32) {
    %c0_i32 = arith.constant 0 : i32
    %c0_i32_0 = arith.constant 0 : i32
    %c0_i32_1 = arith.constant 0 : i32
    return %c0_i32, %c0_i32_0 : i32, i32
  }
  func.func @transform_2(%arg0: i32) -> (i32, i32) {
    %c0_i32 = arith.constant 0 : i32
    %c0_i32_0 = arith.constant 0 : i32
    %c0_i32_1 = arith.constant 0 : i32
    return %c0_i32, %c0_i32_0 : i32, i32
  }
  func.func @transform_3(%arg0: i32) -> (i32, i32) {
    %c0_i32 = arith.constant 0 : i32
    %c0_i32_0 = arith.constant 0 : i32
    %c0_i32_1 = arith.constant 0 : i32
    return %c0_i32, %c0_i32_0 : i32, i32
  }
  func.func @transform_4(%arg0: i32) -> (i32, i32) {
    %c0_i32 = arith.constant 0 : i32
    %c0_i32_0 = arith.constant 0 : i32
    %c0_i32_1 = arith.constant 0 : i32
    return %c0_i32, %c0_i32_0 : i32, i32
  }
}

</mosaic_0001>

<bundles_post_ra>
// kernel: tpu_custom_call.1
= control target key start
LH: loop header
LB: loop body
LE: loop exit
PB: predicated region body
PF: predicated region fallthrough
CT: control target
= control target key end

     0   :  { %9 = vsyncpa [#allocation3], 0  ;;  %s649_s0 = inlined_call_operand.vmem [shape: bf16[32,36], index: 0, kind: input, shape index: {}]   ;;  %s650_s1 = inlined_call_operand.hbm [shape: bf16[36,512], index: 1, kind: input, shape index: {}]   ;;  %s651_s2 = inlined_call_operand.vmem [shape: f32[8,1], index: 2, kind: input, shape index: {}]   ;;  %s652_s3 = inlined_call_operand.vmem [shape: f32[8,1], index: 3, kind: input, shape index: {}]   ;;  %s653_s4 = inlined_call_operand.hbm [shape: f32[32,512], index: 4, kind: output, shape index: {}]  }
   0x1   :  { %10 = vsyncpa [#allocation4], 0  ;;  %s478_s15 = smov [#allocation2]   ;;  %s430_s19 = scalar_lea.hbm %s650_s1, 1280 }
   0x2   :  { %s18_s16 = sshll.u32 %s478_s15, 4  ;;  %p431_p0 = scmp.ne.s32.totalorder %s650_s1, %s430_s19  ;;  %s19_s16 = int_to_ptr.vmem [resolvable:$true] %s18_s16 }
   0x3   :  { %p434_p1 = scmp.lt.u32.totalorder %s430_s19, %s650_s1 }
   0x5   :  { %p436_p2 = pnand %p434_p1, %p431_p0 }
   0x7   :  { %439 = shalt.err (!%p436_p2)
}
   0x8   :  { %s440_s24 = scalar_lea.vmem %s19_s16, 1280  ;;  %p445_p4 = scmp.lt.s32.totalorder %s19_s16, %s19_s16 }
   0x9   :  { %p441_p3 = scmp.ne.s32.totalorder %s19_s16, %s440_s24  ;;  %p446_p5 = scmp.lt.s32.totalorder %s440_s24, %s440_s24 }
   0xb   :  { %p447_p6 = por %p446_p5, %p445_p4 }
   0xd   :  { %p448_p7 = pnand %p447_p6, %p441_p3 }
   0xf   :  { %451 = shalt.err (!%p448_p7)
}
  0x10   :  { %s479_s25 = smov 256   ;;  %s480_s26 = smov 16  }
  0x11   :  { %24 = dma.hbm_to_vmem [thread:$0]  %s650_s1, 1280, %s19_s16, [#allocation3], %s479_s25, %s479_s25, %s480_s26  }
  0x12   :  { %474 = dma.done.wait [#allocation3], 1280  }
  0x13   :  { %475 = vsyncadd [#allocation3], 4294966016  ;;  %v481_v0 = vmov 0   ;;  %v410_v1 = vld [vmem:[#allocation2 + $0x4] ss:$16 sps:$4 sm:$0xff]   ;;  %vm114_vm0 = vcmask 1041408  }
  0x14   :  { %159 = vmatprep.mubr.bf16.mxu0 %v481_v0  ;;  %212 = vmatprep.mubr.bf16.mxu1 %v481_v0  ;;  %v412_v2 = vld [vmem:[#allocation2 + $0xc] ss:$16 sps:$4 sm:$0xff]   ;;  %v414_v3 = vld [vmem:[#allocation2] ss:$16 sps:$4 sm:$0xff]   ;;  %v415_v4 = vld [vmem:[#allocation2 + $0x8] ss:$16 sps:$4 sm:$0xff]  }
  0x15   :  { %408 = vset.pattern.permute.xlu0 %v481_v0  ;;  %409 = vset.pattern.permute.xlu1 %v481_v0  ;;  %v416_v5 = vld [vmem:[#allocation2 + $0x24] ss:$16 sps:$4 sm:$0xff]   ;;  %v418_v6 = vld [vmem:[#allocation2 + $0x2c] ss:$16 sps:$4 sm:$0xff]   ;;  %v420_v7 = vld [vmem:[#allocation2 + $0x20] ss:$16 sps:$4 sm:$0xff]  }
  0x16   :  { %127 = vmatprep.subr.bf16.mxu0 %v410_v1  ;;  %180 = vmatprep.subr.bf16.mxu1 %v412_v2  ;;  %v421_v8 = vld [vmem:[#allocation2 + $0x28] ss:$16 sps:$4 sm:$0xff]   ;;  %v45_v9 = vld [vmem:[#allocation2 + $0x40] sm:$0x33]  ;;  %vm107_vm1 = vcmask 293888  }
  0x17   :  { %128 = vmatpush1.bf16.msra.mxu0 %v414_v3  ;;  %181 = vmatpush1.bf16.msra.mxu1 %v415_v4  ;;  %v46_v10 = vld [vmem:[#allocation2 + $0x48] sm:$0x33]  ;;  %v392_v11 = vcombine.high %v45_v9, %v45_v9  ;;  %v391_v13 = vcombine.low %v45_v9, %v45_v9  ;;  %v426_v17 = vld [vmem:[%s649_s0] sm:$0xff]  }
  0x18   :  { %129 = vmatprep.subr.bf16.mxu0 %v416_v5  ;;  %182 = vmatprep.subr.bf16.mxu1 %v418_v6  ;;  %v394_v12 = vcombine.high %v46_v10, %v46_v10  ;;  %v393_v14 = vcombine.low %v46_v10, %v46_v10  ;;  %v427_v18 = vld [vmem:[%s649_s0 + $0x8] sm:$0xff]  }
  0x19   :  { %v116_v15 = vsel %vm114_vm0, %v391_v13, 0 }
  0x1a   :  { %v122_v16 = vsel %vm114_vm0, %v393_v14, 0 }
  0x1b   :  { %130 = vmatpush1.bf16.msra.mxu0 %v420_v7  ;;  %183 = vmatpush1.bf16.msra.mxu1 %v421_v8 }
  0x1c   :  { %395 = vmatprep.subr.msk.bf16.mxu0 %vm114_vm0, %v392_v11  ;;  %398 = vmatprep.subr.msk.bf16.mxu1 %vm114_vm0, %v394_v12 }
  0x1f   :  { %132 = vmatpush1.bf16.msra.mxu0 %v116_v15  ;;  %185 = vmatpush1.bf16.msra.mxu1 %v122_v16 }
  0x22   :  { %396 = vmatmul.mubr.msk.bf16.vlgmr.msra.gmra.mrb[0].mxu0 %vm107_vm1, %v426_v17  ;;  %399 = vmatmul.mubr.msk.bf16.vlgmr.msra.gmra.mrb[0].mxu1 %vm107_vm1, %v426_v17 }
  0x23   :  { %169 = vmatprep.mubr.bf16.mxu0 %v481_v0  ;;  %222 = vmatprep.mubr.bf16.mxu1 %v481_v0 }
  0x2a   :  { %397 = vmatmul.mubr.msk.bf16.gmra.mrb[4].mxu0 %vm107_vm1, %v427_v18  ;;  %400 = vmatmul.mubr.msk.bf16.gmra.mrb[4].mxu1 %vm107_vm1, %v427_v18 }
  0xf5   :  { %v528_v19 = vpop.f32.mrb[0].mxu0  ;;  %v530_v20 = vpop.f32.mrb[0].mxu1 }
  0xf6   :  { %v253_v21 = vmul.f32 %v528_v19, %v528_v19  ;;  %v534_v22 = vpop.f32.mrb[1].mxu0  ;;  %v536_v23 = vpop.f32.mrb[1].mxu1  ;;  %v255_v24 = vmul.f32 %v530_v20, %v530_v20 }
  0xf7   :  { %v233_v25 = vadd.f32 %v534_v22, %v528_v19  ;;  %v254_v26 = vmul.f32 %v534_v22, %v534_v22  ;;  %v544_v27 = vpop.f32.mrb[2].mxu0  ;;  %v546_v28 = vpop.f32.mrb[2].mxu1  ;;  %v256_v37 = vmul.f32 %v536_v23, %v536_v23 }
  0xf8   :  { %v257_v29 = vmul.f32 %v544_v27, %v544_v27  ;;  %v550_v30 = vpop.f32.mrb[3].mxu0  ;;  %v552_v31 = vpop.f32.mrb[3].mxu1  ;;  %v259_v36 = vmul.f32 %v546_v28, %v546_v28 }
  0xf9   :  { %v238_v32 = vadd.f32 %v550_v30, %v544_v27  ;;  %v258_v33 = vmul.f32 %v550_v30, %v550_v30  ;;  %v234_v34 = vadd.f32 %v233_v25, %v530_v20  ;;  %v269_v35 = vadd.f32 %v254_v26, %v253_v21 }
  0xfa   :  { %v260_v46 = vmul.f32 %v552_v31, %v552_v31 }
  0xfb   :  { %v235_v38 = vadd.f32 %v234_v34, %v536_v23  ;;  %v270_v39 = vadd.f32 %v269_v35, %v255_v24  ;;  %v239_v40 = vadd.f32 %v238_v32, %v546_v28  ;;  %v274_v41 = vadd.f32 %v258_v33, %v257_v29 }
  0xfd   :  { %v565_v42 = vpop.f32.mrb[4].mxu1  ;;  %236 = vadd.xlane.f32.xlu0 %v235_v38  ;;  %v567_v43 = vpop.f32.mrb[4].mxu0  ;;  %v271_v44 = vadd.f32 %v270_v39, %v256_v37  ;;  %v240_v45 = vadd.f32 %v239_v40, %v552_v31  ;;  %v275_v47 = vadd.f32 %v274_v41, %v259_v36  ;;  %v301_v38 = vld [vmem:[%s651_s2] sm:$0xff]  ;;  %s482_s2 = smov [#allocation5]  }
  0xfe   :  { %v261_v48 = vmul.f32 %v567_v43, %v567_v43  ;;  %v574_v49 = vpop.f32.mrb[5].mxu0  ;;  %v576_v50 = vpop.f32.mrb[5].mxu1  ;;  %v263_v56 = vmul.f32 %v565_v42, %v565_v42  ;;  %v303_v41 = vld [vmem:[%s652_s3] sm:$0xff]  ;;  %s369_s3 = sshll.u32 %s482_s2, 4  ;;  %s630_s3 = int_to_ptr.vmem [resolvable:$true] %s369_s3 }
  0xff   :  { %v243_v51 = vadd.f32 %v574_v49, %v567_v43  ;;  %v262_v52 = vmul.f32 %v574_v49, %v574_v49  ;;  %v582_v53 = vpop.f32.mrb[6].mxu1  ;;  %272 = vadd.xlane.f32.xlu1 %v271_v44  ;;  %v584_v54 = vpop.f32.mrb[6].mxu0  ;;  %v276_v55 = vadd.f32 %v275_v47, %v260_v46  ;;  %v264_v4 = vmul.f32 %v576_v50, %v576_v50  ;;  %s452_s9 = scalar_lea.vmem %s630_s3, 2048  ;;  %p457_p9 = scmp.lt.s32.totalorder %s630_s3, %s630_s3 }
 0x100   :  { %v265_v57 = vmul.f32 %v584_v54, %v584_v54  ;;  %v590_v58 = vpop.f32.mrb[7].mxu0  ;;  %v592_v59 = vpop.f32.mrb[7].mxu1  ;;  %v267_v0 = vmul.f32 %v582_v53, %v582_v53  ;;  %p453_p8 = scmp.ne.s32.totalorder %s630_s3, %s452_s9  ;;  %p458_p10 = scmp.lt.s32.totalorder %s452_s9, %s452_s9 }
 0x101   :  { %v248_v60 = vadd.f32 %v590_v58, %v584_v54  ;;  %v266_v61 = vmul.f32 %v590_v58, %v590_v58  ;;  %241 = vadd.xlane.f32.xlu0 %v240_v45  ;;  %v244_v62 = vadd.f32 %v243_v51, %v565_v42  ;;  %v279_v63 = vadd.f32 %v262_v52, %v261_v48 }
 0x102   :  { %v268_v6 = vmul.f32 %v592_v59, %v592_v59  ;;  %p459_p11 = por %p458_p10, %p457_p9 }
 0x103   :  { %v284_v1 = vadd.f32 %v266_v61, %v265_v57  ;;  %v245_v2 = vadd.f32 %v244_v62, %v576_v50  ;;  %v249_v3 = vadd.f32 %v248_v60, %v582_v53  ;;  %v280_v5 = vadd.f32 %v279_v63, %v263_v56 }
 0x104   :  { %p460_p12 = pnand %p459_p11, %p453_p8 }
 0x105   :  { %277 = vadd.xlane.f32.xlu0 %v276_v55  ;;  %246 = vadd.xlane.f32.xlu1 %v245_v2  ;;  %v250_v7 = vadd.f32 %v249_v3, %v592_v59  ;;  %v285_v8 = vadd.f32 %v284_v1, %v267_v0  ;;  %v281_v9 = vadd.f32 %v280_v5, %v264_v4 }
 0x107   :  { %v286_v10 = vadd.f32 %v285_v8, %v268_v6 }
 0x109   :  { %282 = vadd.xlane.f32.xlu0 %v281_v9  ;;  %251 = vadd.xlane.f32.xlu1 %v250_v7 }
 0x10d   :  { %287 = vadd.xlane.f32.xlu1 %v286_v10 }
 0x18a   :  { %v237_v11 = vpop.xlane.xlu0 %236 }
 0x18c   :  { %v273_v12 = vpop.xlane.xlu1 %272 }
 0x18e   :  { %v242_v13 = vpop.xlane.xlu0 %241 }
 0x18f   :  { %v289_v16 = vadd.f32 %v242_v13, %v237_v11 }
 0x192   :  { %v278_v14 = vpop.xlane.xlu0 %277  ;;  %v247_v15 = vpop.xlane.xlu1 %246 }
 0x193   :  { %v290_v17 = vadd.f32 %v289_v16, %v247_v15  ;;  %v292_v24 = vadd.f32 %v278_v14, %v273_v12 }
 0x196   :  { %v283_v18 = vpop.xlane.xlu0 %282  ;;  %v252_v21 = vpop.xlane.xlu1 %251 }
 0x197   :  { %v291_v25 = vadd.f32 %v290_v17, %v252_v21  ;;  %v293_v26 = vadd.f32 %v292_v24, %v283_v18 }
 0x199   :  { %v295_v29 = vmul.f32 0.00048828125, %v291_v25 }
 0x19a   :  { %v288_v32 = vpop.xlane.xlu1 %287 }
 0x19b   :  { %v294_v33 = vadd.f32 %v293_v26, %v288_v32  ;;  %v297_v34 = vmul.f32 %v295_v29, %v295_v29 }
 0x19d   :  { %v296_v35 = vmul.f32 0.00048828125, %v294_v33 }
 0x19f   :  { %v298_v36 = vsub.f32 %v296_v35, %v297_v34 }
 0x1a1   :  { %v299_v37 = vadd.f32 1e-05, %v298_v36 }
 0x1a3   :  { %428 = vrsqrt.f32 %v299_v37 }
 0x1ad   :  { %v429_v39 = vpop.eup %428 }
 0x1ae   :  { %v302_v40 = vmul.f32 %v429_v39, %v301_v38 }
 0x1b0   :  { %308 = vperm.xlu0 %408, %v302_v40   ;;  %v304_v44 = vmul.f32 %v302_v40, %v295_v29 }
 0x1b2   :  { %v305_v45 = vsub.f32 %v303_v41, %v304_v44 }
 0x1b4   :  { %329 = vperm.xlu1 %409, %v305_v45  }
 0x22f   :  { %v309_v46 = vpop.permute.xlu0 %308 }
 0x230   :  { %v311_v47 = vmul.f32 %v309_v46, %v528_v19  ;;  %v312_v48 = vmul.f32 %v309_v46, %v534_v22  ;;  %v313_v51 = vmul.f32 %v309_v46, %v530_v20  ;;  %v314_v52 = vmul.f32 %v309_v46, %v536_v23 }
 0x231   :  { %v315_v55 = vmul.f32 %v309_v46, %v544_v27  ;;  %v316_v56 = vmul.f32 %v309_v46, %v550_v30  ;;  %v317_v57 = vmul.f32 %v309_v46, %v546_v28  ;;  %v318_v60 = vmul.f32 %v309_v46, %v552_v31 }
 0x232   :  { %v319_v61 = vmul.f32 %v309_v46, %v567_v43  ;;  %v320_v62 = vmul.f32 %v309_v46, %v574_v49  ;;  %v321_v19 = vmul.f32 %v309_v46, %v565_v42  ;;  %v322_v22 = vmul.f32 %v309_v46, %v576_v50 }
 0x233   :  { %v323_v20 = vmul.f32 %v309_v46, %v584_v54  ;;  %v324_v23 = vmul.f32 %v309_v46, %v590_v58  ;;  %v325_v27 = vmul.f32 %v309_v46, %v582_v53  ;;  %v326_v30 = vmul.f32 %v309_v46, %v592_v59  ;;  %v330_v63 = vpop.permute.xlu1 %329 }
 0x234   :  { %v332_v28 = vadd.f32 %v330_v63, %v311_v47  ;;  %v333_v31 = vadd.f32 %v330_v63, %v312_v48  ;;  %v334_v43 = vadd.f32 %v330_v63, %v313_v51  ;;  %v335_v0 = vadd.f32 %v330_v63, %v314_v52 }
 0x235   :  { %v336_v49 = vadd.f32 %v330_v63, %v315_v55  ;;  %v337_v1 = vadd.f32 %v330_v63, %v316_v56  ;;  %v338_v42 = vadd.f32 %v330_v63, %v317_v57  ;;  %v339_v2 = vadd.f32 %v330_v63, %v318_v60 }
 0x236   :  { %v340_v50 = vadd.f32 %v330_v63, %v319_v61  ;;  %v341_v3 = vadd.f32 %v330_v63, %v320_v62  ;;  %v342_v54 = vadd.f32 %v330_v63, %v321_v19  ;;  %v343_v4 = vadd.f32 %v330_v63, %v322_v22  ;;  %348 = vst [vmem:[#allocation5] sm:$0xff] %v332_v28 }
 0x237   :  { %349 = vst [vmem:[#allocation5 + $0x8] sm:$0xff] %v333_v31  ;;  %350 = vst [vmem:[#allocation5 + $0x10] sm:$0xff] %v334_v43  ;;  %v344_v53 = vadd.f32 %v330_v63, %v323_v20  ;;  %v345_v58 = vadd.f32 %v330_v63, %v324_v23  ;;  %v346_v59 = vadd.f32 %v330_v63, %v325_v27 }
 0x238   :  { %351 = vst [vmem:[#allocation5 + $0x18] sm:$0xff] %v335_v0  ;;  %v347_v5 = vadd.f32 %v330_v63, %v326_v30  ;;  %352 = vst [vmem:[#allocation5 + $0x20] sm:$0xff] %v336_v49 }
 0x239   :  { %353 = vst [vmem:[#allocation5 + $0x28] sm:$0xff] %v337_v1  ;;  %354 = vst [vmem:[#allocation5 + $0x30] sm:$0xff] %v338_v42 }
 0x23a   :  { %355 = vst [vmem:[#allocation5 + $0x38] sm:$0xff] %v339_v2  ;;  %356 = vst [vmem:[#allocation5 + $0x40] sm:$0xff] %v340_v50 }
 0x23b   :  { %357 = vst [vmem:[#allocation5 + $0x48] sm:$0xff] %v341_v3  ;;  %358 = vst [vmem:[#allocation5 + $0x50] sm:$0xff] %v342_v54 }
 0x23c   :  { %359 = vst [vmem:[#allocation5 + $0x58] sm:$0xff] %v343_v4  ;;  %360 = vst [vmem:[#allocation5 + $0x60] sm:$0xff] %v344_v53 }
 0x23d   :  { %361 = vst [vmem:[#allocation5 + $0x68] sm:$0xff] %v345_v58  ;;  %362 = vst [vmem:[#allocation5 + $0x70] sm:$0xff] %v346_v59 }
 0x23e   :  { %363 = vst [vmem:[#allocation5 + $0x78] sm:$0xff] %v347_v5 }
 0x23f   :  { %463 = shalt.err (!%p460_p12)
}
 0x240   :  { %s464_s12 = scalar_lea.hbm %s653_s4, 2048 }
 0x241   :  { %p465_p13 = scmp.ne.s32.totalorder %s653_s4, %s464_s12  ;;  %p468_p0 = scmp.lt.u32.totalorder %s464_s12, %s653_s4 }
 0x243   :  { %p470_p1 = pnand %p468_p0, %p465_p13 }
 0x245   :  { %473 = shalt.err (!%p470_p1)
}
 0x246   :  { %s483_s17 = smov 512   ;;  %s484_s18 = smov 32  }
 0x247   :  { %375 = dma.vmem_to_hbm [thread:$0]  %s630_s3, 2048, %s653_s4, [#allocation4], %s483_s17, %s483_s17, %s484_s18  }
 0x248   :  { %476 = dma.done.wait [#allocation4], 2048  }
 0x249   :  { %477 = vsyncadd [#allocation4], 4294965248 }
 0x24a   :  { %379 = vsyncpa [#allocation3], 1 }
 0x24b   :  { %380 = vsyncpa [#allocation4], 1 }

</bundles_post_ra>
